<compile_context>
chip_gen: v7x
topology: tpu7x:2x2x1
jax: 0.10.0
libtpu: 0.0.40
codegen_flags: <defaults>
</compile_context>

<pallas_src>
import math

import jax
import jax.numpy as jnp
from jax.experimental import pallas as pl
from jax.experimental.pallas import tpu as pltpu

NEG_SLOPE = 0.01     # nn.LeakyReLU() default negative_slope
LANE = 128           # TPU lane width
HP = 128             # padded hidden size (covers 10 / 100 / 50)
MAX_TILE = 1024      # max batch rows per grid step


def _leaky_relu(x):
    # max(x, 0.01*x) == LeakyReLU(x) for negative_slope < 1 (2 VALU ops).
    return jnp.maximum(x, NEG_SLOPE * x)


def gnn_kernel(b4_ref, z_ref, w1_ref, b1_ref, w2_ref, b2_ref, w3_ref, b3_ref,
               w4_ref, out_ref):
    """One grid step processes a (tile_batch, 1) slab of batch elements.

    Layout: batch on sublanes, features on lanes, so the two real matmuls are
    (tile_batch, 128) @ (128, 128) with the constant bf16 weight as the
    MXU-stationary RHS, streamed once over the whole tile (no inner loop).
    """
    z = z_ref[...]                                                    # (Nt, 1)

    # Layer 1 (1 -> 10): K=1 matmul == broadcast FMA on the VPU.
    h = _leaky_relu(z * w1_ref[...] + b1_ref[...])                    # (Nt, HP)

    # Layers 2 (10 -> 100) and 3 (100 -> 50): weight-stationary MXU matmuls.
    h = _leaky_relu(
        jnp.dot(h.astype(jnp.bfloat16), w2_ref[...],
                preferred_element_type=jnp.float32) + b2_ref[...])    # (Nt, HP)
    h = _leaky_relu(
        jnp.dot(h.astype(jnp.bfloat16), w3_ref[...],
                preferred_element_type=jnp.float32) + b3_ref[...])    # (Nt, HP)

    # Layer 4 (50 -> 1): N=1 matmul == VPU multiply + XLU lane reduction.
    y = jnp.sum(h * w4_ref[...], axis=-1, keepdims=True) + b4_ref[0]  # (Nt, 1)
    out_ref[...] = jnp.tanh(y)


def pack_params(params):
    """Pad torch-layout params once on the host into kernel-friendly shapes."""

    def row(v):
        # (n,) -> (1, LANE): zero-padded row (features on lanes), f32.
        r = jnp.zeros((1, LANE), jnp.float32)
        return r.at[0, : v.shape[0]].set(v.astype(jnp.float32))

    def mat_t(m):
        # torch (out_f, in_f) -> zero-padded (HP, HP) transpose, bf16 for MXU.
        mt = m.astype(jnp.float32).T                      # (in_f, out_f)
        full = jnp.zeros((HP, HP), jnp.float32)
        full = full.at[: mt.shape[0], : mt.shape[1]].set(mt)
        return full.astype(jnp.bfloat16)

    return (
        params["b4"].astype(jnp.float32).reshape(1),      # b4 -> SMEM scalar
        row(params["w1"][:, 0]),      # W1 torch (10, 1)   -> (1, LANE)
        row(params["b1"]),            # b1 (10,)           -> (1, LANE)
        mat_t(params["w2"]),          # W2 torch (100, 10) -> W2^T (HP, HP) bf16
        row(params["b2"]),            # b2 (100,)          -> (1, LANE)
        mat_t(params["w3"]),          # W3 torch (50, 100) -> W3^T (HP, HP) bf16
        row(params["b3"]),            # b3 (50,)           -> (1, LANE)
        row(params["w4"][0, :]),      # W4 torch (1, 50)   -> (1, LANE)
    )


def _choose_tile_batch(b8):
    """Batch rows per grid step: multiple of 8, >= 2 grid steps whenever the
    batch allows (v7x dual-TC sharding), capped so activations stay small."""
    if b8 <= 8:
        return 8
    half = -(-b8 // 2)
    half = -(-half // 8) * 8
    return min(MAX_TILE, half)


def gnn_forward(z, params, *, tile_batch=None):
    """z: (B, 1) float32, params: torch-layout dict -> (B, 1) float32."""
    B = z.shape[0]
    b8 = -(-B // 8) * 8
    if tile_batch is None:
        tile_batch = _choose_tile_batch(b8)
    n_tiles = -(-b8 // tile_batch)
    Bp = n_tiles * tile_batch

    zf = z.reshape(-1).astype(jnp.float32)
    if Bp != B:
        zf = jnp.pad(zf, (0, Bp - B))
    z2d = zf.reshape(Bp, 1)

    packed = pack_params(params)

    def resident(shape):
        return pl.BlockSpec(shape, lambda i: (0, 0))   # stays VMEM-resident

    in_specs = [
        pl.BlockSpec(memory_space=pltpu.MemorySpace.SMEM),   # b4 scalar
        pl.BlockSpec((tile_batch, 1), lambda i: (i, 0)),     # z tile
        resident((1, LANE)),    # w1 row
        resident((1, LANE)),    # b1 row
        resident((HP, HP)),     # W2^T (bf16)
        resident((1, LANE)),    # b2 row
        resident((HP, HP)),     # W3^T (bf16)
        resident((1, LANE)),    # b3 row
        resident((1, LANE)),    # w4 row
    ]

    # Padded (issued) flops, not the 6060-MAC model count.
    padded_flops_per_elem = 2 * (HP * HP * 2) + 2 * 2 * HP + 6 * HP
    out2d = pl.pallas_call(
        gnn_kernel,
        out_shape=jax.ShapeDtypeStruct((Bp, 1), jnp.float32),
        grid=(n_tiles,),
        in_specs=in_specs,
        out_specs=pl.BlockSpec((tile_batch, 1), lambda i: (i, 0)),
        compiler_params=pltpu.CompilerParams(
            dimension_semantics=("parallel",),
            vmem_limit_bytes=32 * 1024 * 1024,
        ),
        cost_estimate=pl.CostEstimate(
            flops=padded_flops_per_elem * Bp,
            transcendentals=Bp,
            bytes_accessed=8 * Bp + 2 * HP * HP * 2 + 6 * LANE * 4 + 4,
        ),
    )(packed[0], z2d, *packed[1:])

    return out2d[:B]


def init_params(key):
    """torch nn.Linear default init: U(-1/sqrt(fan_in), 1/sqrt(fan_in)).
    Weights kept in torch layout (out_f, in_f); biases (out_f,)."""
    layer_dims = [(1, 10), (10, 100), (100, 50), (50, 1)]   # (in_f, out_f)
    params = {}
    for i, (fan_in, fan_out) in enumerate(layer_dims, start=1):
        key, kw, kb = jax.random.split(key, 3)
        bound = 1.0 / math.sqrt(fan_in)
        params[f"w{i}"] = jax.random.uniform(
            kw, (fan_out, fan_in), jnp.float32, -bound, bound)
        params[f"b{i}"] = jax.random.uniform(
            kb, (fan_out,), jnp.float32, -bound, bound)
    return params


def gnn_reference(z, params):
    """Full-f32 reference of the PyTorch forward."""
    P = jax.lax.Precision.HIGHEST
    h = z
    for i in range(1, 4):
        h = jnp.dot(h, params[f"w{i}"].T, precision=P) + params[f"b{i}"]
        h = jnp.where(h >= 0, h, NEG_SLOPE * h)
    h = jnp.dot(h, params["w4"].T, precision=P) + params["b4"]
    return jnp.tanh(h)


if __name__ == "__main__":
    key = jax.random.PRNGKey(0)
    key, kz = jax.random.split(key)

    B = 300                         # small; exercises padding + a 2-step grid
    z = jax.random.normal(kz, (B, 1), jnp.float32)
    params = init_params(key)

    out = jax.block_until_ready(gnn_forward(z, params))
    ref = gnn_reference(z, params)

    assert out.shape == (B, 1)
    max_err = float(jnp.max(jnp.abs(out - ref)))
    # The two hidden matmuls run as single bf16 MXU passes with f32
    # accumulation (same as TPU default matmul precision), hence the
    # tolerance vs the full-f32 reference.
    assert max_err < 5e-3, f"max abs err {max_err}"

    print("KERNEL_OK")
</pallas_src>

<mosaic_0001>
module attributes {stable_mosaic.version = 11 : i64} {
  func.func @gnn_kernel(%arg0: i32, %arg1: memref<1xf32, #tpu.memory_space<smem>>, %arg2: memref<152x1xf32, #tpu.memory_space<vmem>>, %arg3: memref<1x128xf32, #tpu.memory_space<vmem>>, %arg4: memref<1x128xf32, #tpu.memory_space<vmem>>, %arg5: memref<128x128xbf16, #tpu.memory_space<vmem>>, %arg6: memref<1x128xf32, #tpu.memory_space<vmem>>, %arg7: memref<128x128xbf16, #tpu.memory_space<vmem>>, %arg8: memref<1x128xf32, #tpu.memory_space<vmem>>, %arg9: memref<1x128xf32, #tpu.memory_space<vmem>>, %arg10: memref<152x1xf32, #tpu.memory_space<vmem>>) attributes {dimension_semantics = [#tpu.dimension_semantics<parallel>], iteration_bounds = array<i64: 2>, scalar_prefetch = 0 : i64, scratch_operands = 0 : i64, tpu.core_type = #tpu.core_type<tc>, window_params = [{transform_indices = @transform_0, window_bounds = array<i64: 1>}, {transform_indices = @transform_1, window_bounds = array<i64: 152, 1>}, {pipeline_mode = #tpu.pipeline_mode<synchronous>, transform_indices = @transform_2, window_bounds = array<i64: 1, 128>}, {pipeline_mode = #tpu.pipeline_mode<synchronous>, transform_indices = @transform_3, window_bounds = array<i64: 1, 128>}, {pipeline_mode = #tpu.pipeline_mode<synchronous>, transform_indices = @transform_4, window_bounds = array<i64: 128, 128>}, {pipeline_mode = #tpu.pipeline_mode<synchronous>, transform_indices = @transform_5, window_bounds = array<i64: 1, 128>}, {pipeline_mode = #tpu.pipeline_mode<synchronous>, transform_indices = @transform_6, window_bounds = array<i64: 128, 128>}, {pipeline_mode = #tpu.pipeline_mode<synchronous>, transform_indices = @transform_7, window_bounds = array<i64: 1, 128>}, {pipeline_mode = #tpu.pipeline_mode<synchronous>, transform_indices = @transform_8, window_bounds = array<i64: 1, 128>}, {transform_indices = @transform_9, window_bounds = array<i64: 152, 1>}]} {
    %c0 = arith.constant 0 : index
    %c0_0 = arith.constant 0 : index
    %0 = vector.load %arg2[%c0, %c0_0] : memref<152x1xf32, #tpu.memory_space<vmem>>, vector<152x1xf32>
    %c0_1 = arith.constant 0 : index
    %c0_2 = arith.constant 0 : index
    %1 = vector.load %arg3[%c0_1, %c0_2] : memref<1x128xf32, #tpu.memory_space<vmem>>, vector<1x128xf32>
    %2 = vector.broadcast %0 : vector<152x1xf32> to vector<152x128xf32>
    %3 = vector.broadcast %1 : vector<1x128xf32> to vector<152x128xf32>
    %4 = arith.mulf %2, %3 : vector<152x128xf32>
    %c0_3 = arith.constant 0 : index
    %c0_4 = arith.constant 0 : index
    %5 = vector.load %arg4[%c0_3, %c0_4] : memref<1x128xf32, #tpu.memory_space<vmem>>, vector<1x128xf32>
    %6 = vector.broadcast %5 : vector<1x128xf32> to vector<152x128xf32>
    %7 = arith.addf %4, %6 : vector<152x128xf32>
    %cst = arith.constant 0.00999999977 : f32
    %8 = vector.broadcast %cst : f32 to vector<152x128xf32>
    %9 = arith.mulf %8, %7 : vector<152x128xf32>
    %10 = arith.maximumf %7, %9 : vector<152x128xf32>
    %11 = arith.truncf %10 : vector<152x128xf32> to vector<152x128xbf16>
    %c0_5 = arith.constant 0 : index
    %c0_6 = arith.constant 0 : index
    %12 = vector.load %arg5[%c0_5, %c0_6] : memref<128x128xbf16, #tpu.memory_space<vmem>>, vector<128x128xbf16>
    %cst_7 = arith.constant dense<0.000000e+00> : vector<152x128xf32>
    %13 = tpu.matmul %11, %12, %cst_7 {dimension_numbers = #tpu.dot_dimension_numbers<[1], [0], [0], [1], [0, 0, 1, 1], [], []>} : vector<152x128xbf16>, vector<128x128xbf16>, vector<152x128xf32> -> vector<152x128xf32>
    %c0_8 = arith.constant 0 : index
    %c0_9 = arith.constant 0 : index
    %14 = vector.load %arg6[%c0_8, %c0_9] : memref<1x128xf32, #tpu.memory_space<vmem>>, vector<1x128xf32>
    %15 = vector.broadcast %14 : vector<1x128xf32> to vector<152x128xf32>
    %16 = arith.addf %13, %15 : vector<152x128xf32>
    %cst_10 = arith.constant 0.00999999977 : f32
    %17 = vector.broadcast %cst_10 : f32 to vector<152x128xf32>
    %18 = arith.mulf %17, %16 : vector<152x128xf32>
    %19 = arith.maximumf %16, %18 : vector<152x128xf32>
    %20 = arith.truncf %19 : vector<152x128xf32> to vector<152x128xbf16>
    %c0_11 = arith.constant 0 : index
    %c0_12 = arith.constant 0 : index
    %21 = vector.load %arg7[%c0_11, %c0_12] : memref<128x128xbf16, #tpu.memory_space<vmem>>, vector<128x128xbf16>
    %cst_13 = arith.constant dense<0.000000e+00> : vector<152x128xf32>
    %22 = tpu.matmul %20, %21, %cst_13 {dimension_numbers = #tpu.dot_dimension_numbers<[1], [0], [0], [1], [0, 0, 1, 1], [], []>} : vector<152x128xbf16>, vector<128x128xbf16>, vector<152x128xf32> -> vector<152x128xf32>
    %c0_14 = arith.constant 0 : index
    %c0_15 = arith.constant 0 : index
    %23 = vector.load %arg8[%c0_14, %c0_15] : memref<1x128xf32, #tpu.memory_space<vmem>>, vector<1x128xf32>
    %24 = vector.broadcast %23 : vector<1x128xf32> to vector<152x128xf32>
    %25 = arith.addf %22, %24 : vector<152x128xf32>
    %cst_16 = arith.constant 0.00999999977 : f32
    %26 = vector.broadcast %cst_16 : f32 to vector<152x128xf32>
    %27 = arith.mulf %26, %25 : vector<152x128xf32>
    %28 = arith.maximumf %25, %27 : vector<152x128xf32>
    %c0_17 = arith.constant 0 : index
    %c0_18 = arith.constant 0 : index
    %29 = vector.load %arg9[%c0_17, %c0_18] : memref<1x128xf32, #tpu.memory_space<vmem>>, vector<1x128xf32>
    %30 = vector.broadcast %29 : vector<1x128xf32> to vector<152x128xf32>
    %31 = arith.mulf %28, %30 : vector<152x128xf32>
    %cst_19 = arith.constant dense<0.000000e+00> : vector<152xf32>
    %32 = vector.multi_reduction <add>, %31, %cst_19 [1] : vector<152x128xf32> to vector<152xf32>
    %33 = vector.shape_cast %32 : vector<152xf32> to vector<152x1xf32>
    %c0_20 = arith.constant 0 : index
    %34 = memref.load %arg1[%c0_20] : memref<1xf32, #tpu.memory_space<smem>>
    %35 = vector.broadcast %34 : f32 to vector<152x1xf32>
    %36 = arith.addf %33, %35 : vector<152x1xf32>
    %37 = math.tanh %36 : vector<152x1xf32>
    %c0_21 = arith.constant 0 : index
    %c0_22 = arith.constant 0 : index
    %38 = vector.load %arg10[%c0_21, %c0_22] : memref<152x1xf32, #tpu.memory_space<vmem>>, vector<152x1xf32>
    tpu.vector_store %arg10[%c0_21, %c0_22], %37 {strides = array<i32>} : memref<152x1xf32, #tpu.memory_space<vmem>>, vector<152x1xf32>,
    return
  }
  func.func @transform_0(%arg0: i32) -> i32 {
    %c0_i32 = arith.constant 0 : i32
    %c0_i32_0 = arith.constant 0 : i32
    return %c0_i32 : i32
  }
  func.func @transform_1(%arg0: i32) -> (i32, i32) {
    %c0_i32 = arith.constant 0 : i32
    %c0_i32_0 = arith.constant 0 : i32
    return %arg0, %c0_i32 : i32, i32
  }
  func.func @transform_2(%arg0: i32) -> (i32, i32) {
    %c0_i32 = arith.constant 0 : i32
    %c0_i32_0 = arith.constant 0 : i32
    %c0_i32_1 = arith.constant 0 : i32
    return %c0_i32, %c0_i32_0 : i32, i32
  }
  func.func @transform_3(%arg0: i32) -> (i32, i32) {
    %c0_i32 = arith.constant 0 : i32
    %c0_i32_0 = arith.constant 0 : i32
    %c0_i32_1 = arith.constant 0 : i32
    return %c0_i32, %c0_i32_0 : i32, i32
  }
  func.func @transform_4(%arg0: i32) -> (i32, i32) {
    %c0_i32 = arith.constant 0 : i32
    %c0_i32_0 = arith.constant 0 : i32
    %c0_i32_1 = arith.constant 0 : i32
    return %c0_i32, %c0_i32_0 : i32, i32
  }
  func.func @transform_5(%arg0: i32) -> (i32, i32) {
    %c0_i32 = arith.constant 0 : i32
    %c0_i32_0 = arith.constant 0 : i32
    %c0_i32_1 = arith.constant 0 : i32
    return %c0_i32, %c0_i32_0 : i32, i32
  }
  func.func @transform_6(%arg0: i32) -> (i32, i32) {
    %c0_i32 = arith.constant 0 : i32
    %c0_i32_0 = arith.constant 0 : i32
    %c0_i32_1 = arith.constant 0 : i32
    return %c0_i32, %c0_i32_0 : i32, i32
  }
  func.func @transform_7(%arg0: i32) -> (i32, i32) {
    %c0_i32 = arith.constant 0 : i32
    %c0_i32_0 = arith.constant 0 : i32
    %c0_i32_1 = arith.constant 0 : i32
    return %c0_i32, %c0_i32_0 : i32, i32
  }
  func.func @transform_8(%arg0: i32) -> (i32, i32) {
    %c0_i32 = arith.constant 0 : i32
    %c0_i32_0 = arith.constant 0 : i32
    %c0_i32_1 = arith.constant 0 : i32
    return %c0_i32, %c0_i32_0 : i32, i32
  }
  func.func @transform_9(%arg0: i32) -> (i32, i32) {
    %c0_i32 = arith.constant 0 : i32
    %c0_i32_0 = arith.constant 0 : i32
    return %arg0, %c0_i32 : i32, i32
  }
}

</mosaic_0001>

<bundles_post_ra>
// kernel: tpu_custom_call.1
= control target key start
LH: loop header
LB: loop body
LE: loop exit
PB: predicated region body
PF: predicated region fallthrough
CT: control target
= control target key end

     0   :  { %s1449_s11 = smov 0   ;;  %s1723_s0 = inlined_call_operand.<no memory space> [shape: f32[1], index: 0, kind: input, shape index: {}]   ;;  %s1724_s1 = inlined_call_operand.vmem [shape: f32[304,1], index: 1, kind: input, shape index: {}]   ;;  %s1725_s2 = inlined_call_operand.vmem [shape: f32[1,128], index: 2, kind: input, shape index: {}]   ;;  %s1726_s3 = inlined_call_operand.vmem [shape: f32[1,128], index: 3, kind: input, shape index: {}]   ;;  %s1727_s4 = inlined_call_operand.vmem [shape: bf16[128,128], index: 4, kind: input, shape index: {}]   ;;  %s1728_s5 = inlined_call_operand.vmem [shape: f32[1,128], index: 5, kind: input, shape index: {}]   ;;  %s1729_s6 = inlined_call_operand.vmem [shape: bf16[128,128], index: 6, kind: input, shape index: {}]   ;;  %s1730_s7 = inlined_call_operand.vmem [shape: f32[1,128], index: 7, kind: input, shape index: {}]   ;;  %s1731_s8 = inlined_call_operand.vmem [shape: f32[1,128], index: 8, kind: input, shape index: {}]   ;;  %s1732_s9 = inlined_call_operand.vmem [shape: f32[304,1], index: 9, kind: output, shape index: {}]  }
   0x1   :  { %14 = sst [smem:[#allocation2]] %s1723_s0 }
   0x2 LB: > { %s1184_s12 = sadd.s32 4294967295, %s1393_s11   ;;  %p1188_p0 = scmp.ge.s32.totalorder %s1393_s11, 1  ;;  %s1393_s11 = sphi %s1449_s11, %s20_s11  }
   0x3   : > { %p289_p1 = scmp.lt.s32.totalorder %s1393_s11, 3 }
   0x5   : > { %p290_p2 = pnand %p1188_p0, %p289_p1 }
   0x6   : > { %s325_s13 = smul.u32 (!%p290_p2), 19, %s1184_s12  ;;  %v1395_v0 = vmov (!%p290_p2), 0   ;;  %v1333_v1 = vld [vmem:[%s1727_s4] sm:$0xff] (!%p290_p2)   ;;  %v1334_v2 = vld [vmem:[%s1727_s4 + $0x8] sm:$0xff] (!%p290_p2)   ;;  %v1335_v3 = vld [vmem:[%s1727_s4 + $0x10] sm:$0xff] (!%p290_p2)   ;;  %s1068_s21 = sld [smem:[#allocation2]] (!%p290_p2) }
   0x7   : > { %293 = sbr.rel (%p290_p2) target bundleno = 799 (0x31f), region = 56  ;;  %1332 = vset.pattern.permute.xlu1 (!%p290_p2), %v1395_v0  ;;  %1331 = vset.pattern.permute.xlu0 (!%p290_p2), %v1395_v0  ;;  %v1336_v8 = vld [vmem:[%s1727_s4 + $0x18] sm:$0xff] (!%p290_p2)   ;;  %v1337_v11 = vld [vmem:[%s1727_s4 + $0x20] sm:$0xff] (!%p290_p2)   ;;  %v1338_v14 = vld [vmem:[%s1727_s4 + $0x28] sm:$0xff] (!%p290_p2)   ;;  %vm1108_vm0 = vcmask (!%p290_p2), 7168  }
   0x8   : > { %p326_p3 = scmp.lt.s32.totalorder (!%p290_p2), %s325_s13, 37  ;;  %1250 = vmatprep.subr.bf16.mxu0 (!%p290_p2), %v1333_v1  ;;  %v1339_v17 = vld [vmem:[%s1727_s4 + $0x30] sm:$0xff] (!%p290_p2)   ;;  %v1340_v20 = vld [vmem:[%s1727_s4 + $0x38] sm:$0xff] (!%p290_p2)   ;;  %v1341_v28 = vld [vmem:[%s1729_s6] sm:$0xff] (!%p290_p2)  }
   0x9   : > { %1251 = vmatpush3.bf16.msra.mxu0 (!%p290_p2), %v1333_v1  ;;  %v1342_v29 = vld [vmem:[%s1729_s6 + $0x8] sm:$0xff] (!%p290_p2)   ;;  %1286 = vmatprep.subr.bf16.mxu1 (!%p290_p2), %v1341_v28  ;;  %v1343_v30 = vld [vmem:[%s1729_s6 + $0x10] sm:$0xff] (!%p290_p2)   ;;  %v1344_v31 = vld [vmem:[%s1729_s6 + $0x18] sm:$0xff] (!%p290_p2)  }
   0xa   : > { %1252 = vmatprep.subr.bf16.mxu0 (!%p290_p2), %v1334_v2  ;;  %1287 = vmatpush3.bf16.msra.mxu1 (!%p290_p2), %v1341_v28  ;;  %v1345_v32 = vld [vmem:[%s1729_s6 + $0x20] sm:$0xff] (!%p290_p2)  }
   0xb   : > { %1288 = vmatprep.subr.bf16.mxu1 (!%p290_p2), %v1342_v29  ;;  %v1528_v33 = vld [vmem:[%s1725_s2] ss:$0 sm:$0xff] (!%p290_p2) }
   0xc   : > { %v1533_v36 = vld [vmem:[%s1726_s3] ss:$0 sm:$0xff] (!%p290_p2) }
   0xd   : > { %1253 = vmatpush3.bf16.msra.mxu0 (!%p290_p2), %v1334_v2 }
   0xe   : > { %s1734_s13 = smov (!%p326_p3, %s325_s13), 37  ;;  %1254 = vmatprep.subr.bf16.mxu0 %v1335_v3  ;;  %1289 = vmatpush3.bf16.msra.mxu1 %v1342_v29 }
   0xf   : > { %s1189_s17 = sshll.u32 %s1734_s13, 3  ;;  %1290 = vmatprep.subr.bf16.mxu1 %v1343_v30 }
  0x10   : > { %s1474_s22 = scalar_lea.vmem %s1724_s1, %s1189_s17  ;;  %s1666_s24 = scalar_lea.vmem %s1732_s9, %s1189_s17 }
  0x11   : > { %v340_v4 = vld [vmem:[%s1474_s22 + $0x10] sm:$0xff]  ;;  %v338_v5 = vld [vmem:[%s1474_s22] sm:$0xff]  ;;  %v341_v6 = vld [vmem:[%s1474_s22 + $0x18] sm:$0xff]  ;;  %1255 = vmatpush3.bf16.msra.mxu0 %v1335_v3 }
  0x12   : > { %370 = vperm.xlu1 %1332, %v340_v4   ;;  %360 = vperm.xlu0 %1331, %v338_v5   ;;  %v339_v7 = vld [vmem:[%s1474_s22 + $0x8] sm:$0xff]  ;;  %v342_v10 = vld [vmem:[%s1474_s22 + $0x20] sm:$0xff]  ;;  %v345_v12 = vld [vmem:[%s1474_s22 + $0x38] sm:$0xff] }
  0x13   : > { %v343_v9 = vld [vmem:[%s1474_s22 + $0x28] sm:$0xff]  ;;  %1256 = vmatprep.subr.bf16.mxu0 %v1336_v8  ;;  %v344_v13 = vld [vmem:[%s1474_s22 + $0x30] sm:$0xff]  ;;  %v346_v16 = vld [vmem:[%s1474_s22 + $0x40] sm:$0xff]  ;;  %1291 = vmatpush3.bf16.msra.mxu1 %v1343_v30 }
  0x14   : > { %v347_v15 = vld [vmem:[%s1474_s22 + $0x48] sm:$0xff]  ;;  %v349_v18 = vld [vmem:[%s1474_s22 + $0x58] sm:$0xff]  ;;  %v348_v19 = vld [vmem:[%s1474_s22 + $0x50] sm:$0xff]  ;;  %1292 = vmatprep.subr.bf16.mxu1 %v1344_v31 }
  0x15   : > { %1257 = vmatpush3.bf16.msra.mxu0 %v1336_v8  ;;  %v351_v21 = vld [vmem:[%s1474_s22 + $0x68] sm:$0xff]  ;;  %v350_v22 = vld [vmem:[%s1474_s22 + $0x60] sm:$0xff]  ;;  %v353_v23 = vld [vmem:[%s1474_s22 + $0x78] sm:$0xff] }
  0x16   : > { %375 = vperm.xlu1 %1332, %v341_v6   ;;  %365 = vperm.xlu0 %1331, %v339_v7   ;;  %v352_v24 = vld [vmem:[%s1474_s22 + $0x70] sm:$0xff]  ;;  %v355_v25 = vld [vmem:[%s1474_s22 + $0x88] sm:$0xff]  ;;  %v354_v26 = vld [vmem:[%s1474_s22 + $0x80] sm:$0xff] }
  0x17   : > { %1258 = vmatprep.subr.bf16.mxu0 %v1337_v11  ;;  %v356_v27 = vld [vmem:[%s1474_s22 + $0x90] sm:$0xff]  ;;  %1293 = vmatpush3.bf16.msra.mxu1 %v1344_v31 }
  0x18   : > { %1294 = vmatprep.subr.bf16.mxu1 %v1345_v32 }
  0x19   : > { %1259 = vmatpush3.bf16.msra.mxu0 %v1337_v11 }
  0x1a   : > { %385 = vperm.xlu1 %1332, %v343_v9   ;;  %380 = vperm.xlu0 %1331, %v342_v10  }
  0x1b   : > { %1260 = vmatprep.subr.bf16.mxu0 %v1338_v14  ;;  %1295 = vmatpush3.bf16.msra.mxu1 %v1345_v32 }
  0x1d   : > { %1261 = vmatpush3.bf16.msra.mxu0 %v1338_v14 }
  0x1e   : > { %395 = vperm.xlu1 %1332, %v345_v12   ;;  %390 = vperm.xlu0 %1331, %v344_v13  }
  0x1f   : > { %1262 = vmatprep.subr.bf16.mxu0 %v1339_v17 }
  0x21   : > { %1263 = vmatpush3.bf16.msra.mxu0 %v1339_v17 }
  0x22   : > { %405 = vperm.xlu1 %1332, %v347_v15   ;;  %400 = vperm.xlu0 %1331, %v346_v16  }
  0x23   : > { %1264 = vmatprep.subr.bf16.mxu0 %v1340_v20 }
  0x25   : > { %1265 = vmatpush3.bf16.msra.mxu0 %v1340_v20 }
  0x26   : > { %415 = vperm.xlu1 %1332, %v349_v18   ;;  %410 = vperm.xlu0 %1331, %v348_v19  }
  0x2a   : > { %425 = vperm.xlu1 %1332, %v351_v21   ;;  %420 = vperm.xlu0 %1331, %v350_v22  }
  0x2e   : > { %435 = vperm.xlu1 %1332, %v353_v23   ;;  %430 = vperm.xlu0 %1331, %v352_v24  }
  0x32   : > { %445 = vperm.xlu1 %1332, %v355_v25   ;;  %440 = vperm.xlu0 %1331, %v354_v26  }
  0x36   : > { %450 = vperm.xlu0 %1331, %v356_v27  }
  0x91   : > { %v371_v34 = vpop.permute.xlu1 %370  ;;  %v361_v35 = vpop.permute.xlu0 %360 }
  0x92   : > { %v461_v37 = vmul.f32 %v1528_v33, %v371_v34  ;;  %v459_v38 = vmul.f32 %v1528_v33, %v361_v35 }
  0x94   : > { %v487_v39 = vadd.f32 %v1533_v36, %v461_v37  ;;  %v485_v40 = vadd.f32 %v1533_v36, %v459_v38 }
  0x95   : > { %v376_v41 = vpop.permute.xlu1 %375  ;;  %v366_v42 = vpop.permute.xlu0 %365 }
  0x96   : > { %v462_v43 = vmul.f32 %v1528_v33, %v376_v41  ;;  %v460_v44 = vmul.f32 %v1528_v33, %v366_v42  ;;  %v506_v47 = vmul.f32 0.01, %v487_v39  ;;  %v504_v50 = vmul.f32 0.01, %v485_v40 }
  0x98   : > { %v488_v45 = vadd.f32 %v1533_v36, %v462_v43  ;;  %v486_v46 = vadd.f32 %v1533_v36, %v460_v44  ;;  %v525_v59 = vmax.f32 %v487_v39, %v506_v47  ;;  %v523_v62 = vmax.f32 %v485_v40, %v504_v50 }
  0x99   : > { %v386_v48 = vpop.permute.xlu1 %385  ;;  %v381_v49 = vpop.permute.xlu0 %380 }
  0x9a   : > { %v507_v51 = vmul.f32 0.01, %v488_v45  ;;  %v464_v52 = vmul.f32 %v1528_v33, %v386_v48  ;;  %v463_v53 = vmul.f32 %v1528_v33, %v381_v49  ;;  %v505_v54 = vmul.f32 0.01, %v486_v46 }
  0x9c   : > { %v526_v55 = vmax.f32 %v488_v45, %v507_v51  ;;  %v490_v56 = vadd.f32 %v1533_v36, %v464_v52  ;;  %v489_v57 = vadd.f32 %v1533_v36, %v463_v53  ;;  %v524_v58 = vmax.f32 %v486_v46, %v505_v54 }
  0x9d   : > { %v396_v60 = vpop.permute.xlu1 %395  ;;  %v391_v61 = vpop.permute.xlu0 %390 }
  0x9e   : > { %v509_v63 = vmul.f32 0.01, %v490_v56  ;;  %v508_v0 = vmul.f32 0.01, %v489_v57  ;;  %v466_v1 = vmul.f32 %v1528_v33, %v396_v60  ;;  %v465_v2 = vmul.f32 %v1528_v33, %v391_v61 }
  0x9f   : > { %v542_v3 = vpack.c.bf16 %v524_v58, %v523_v62  ;;  %v543_v4 = vpack.c.bf16 %v526_v55, %v525_v59 }
  0xa0   : > { %v528_v5 = vmax.f32 %v490_v56, %v509_v63  ;;  %v527_v6 = vmax.f32 %v489_v57, %v508_v0  ;;  %v492_v7 = vadd.f32 %v1533_v36, %v466_v1  ;;  %v491_v8 = vadd.f32 %v1533_v36, %v465_v2 }
  0xa1   : > { %1266 = vmatprep.mubr.bf16.mxu0 %v542_v3  ;;  %v406_v9 = vpop.permute.xlu1 %405  ;;  %v401_v10 = vpop.permute.xlu0 %400 }
  0xa2   : > { %v511_v11 = vmul.f32 0.01, %v492_v7  ;;  %v510_v12 = vmul.f32 0.01, %v491_v8  ;;  %v468_v13 = vmul.f32 %v1528_v33, %v406_v9  ;;  %1267 = vmatmul.mubr.bf16.vlgmr.msra.gmra.mrb[0].mxu0 %v543_v4  ;;  %v467_v14 = vmul.f32 %v1528_v33, %v401_v10 }
  0xa3   : > { %v544_v15 = vpack.c.bf16 %v528_v5, %v527_v6 }
  0xa4   : > { %v530_v16 = vmax.f32 %v492_v7, %v511_v11  ;;  %v529_v17 = vmax.f32 %v491_v8, %v510_v12  ;;  %v494_v18 = vadd.f32 %v1533_v36, %v468_v13  ;;  %v493_v19 = vadd.f32 %v1533_v36, %v467_v14  ;;  %v1346_v14 = vld [vmem:[%s1729_s6 + $0x28] sm:$0xff]  }
  0xa5   : > { %1270 = vmatprep.mubr.bf16.mxu0 %v544_v15  ;;  %v416_v20 = vpop.permute.xlu1 %415  ;;  %v411_v21 = vpop.permute.xlu0 %410  ;;  %1296 = vmatprep.subr.bf16.mxu1 %v1346_v14  ;;  %v1585_v15 = vld [vmem:[%s1728_s5] ss:$0 sm:$0xff] }
  0xa6   : > { %v513_v22 = vmul.f32 0.01, %v494_v18  ;;  %v512_v23 = vmul.f32 0.01, %v493_v19  ;;  %v470_v24 = vmul.f32 %v1528_v33, %v416_v20  ;;  %v469_v25 = vmul.f32 %v1528_v33, %v411_v21  ;;  %1297 = vmatpush3.bf16.msra.mxu1 %v1346_v14 }
  0xa7   : > { %v545_v26 = vpack.c.bf16 %v530_v16, %v529_v17 }
  0xa8   : > { %v532_v27 = vmax.f32 %v494_v18, %v513_v22  ;;  %v531_v28 = vmax.f32 %v493_v19, %v512_v23  ;;  %v496_v29 = vadd.f32 %v1533_v36, %v470_v24  ;;  %v495_v30 = vadd.f32 %v1533_v36, %v469_v25 }
  0xa9   : > { %v426_v31 = vpop.permute.xlu1 %425  ;;  %v421_v32 = vpop.permute.xlu0 %420 }
  0xaa   : > { %v515_v34 = vmul.f32 0.01, %v496_v29  ;;  %v514_v35 = vmul.f32 0.01, %v495_v30  ;;  %v472_v37 = vmul.f32 %v1528_v33, %v426_v31  ;;  %1271 = vmatmul.mubr.bf16.gmra.mrb[4].mxu0 %v545_v26  ;;  %v471_v38 = vmul.f32 %v1528_v33, %v421_v32 }
  0xab   : > { %v546_v39 = vpack.c.bf16 %v532_v27, %v531_v28 }
  0xac   : > { %v534_v40 = vmax.f32 %v496_v29, %v515_v34  ;;  %v533_v41 = vmax.f32 %v495_v30, %v514_v35  ;;  %v498_v42 = vadd.f32 %v1533_v36, %v472_v37  ;;  %v497_v43 = vadd.f32 %v1533_v36, %v471_v38 }
  0xad   : > { %1274 = vmatprep.mubr.bf16.mxu0 %v546_v39  ;;  %v436_v44 = vpop.permute.xlu1 %435  ;;  %v431_v45 = vpop.permute.xlu0 %430 }
  0xae   : > { %v517_v46 = vmul.f32 0.01, %v498_v42  ;;  %v516_v47 = vmul.f32 0.01, %v497_v43  ;;  %v474_v48 = vmul.f32 %v1528_v33, %v436_v44  ;;  %v473_v49 = vmul.f32 %v1528_v33, %v431_v45 }
  0xaf   : > { %v547_v50 = vpack.c.bf16 %v534_v40, %v533_v41 }
  0xb0   : > { %v536_v51 = vmax.f32 %v498_v42, %v517_v46  ;;  %v535_v52 = vmax.f32 %v497_v43, %v516_v47  ;;  %v500_v53 = vadd.f32 %v1533_v36, %v474_v48  ;;  %v499_v54 = vadd.f32 %v1533_v36, %v473_v49 }
  0xb1   : > { %v446_v55 = vpop.permute.xlu1 %445  ;;  %v441_v56 = vpop.permute.xlu0 %440 }
  0xb2   : > { %v519_v57 = vmul.f32 0.01, %v500_v53  ;;  %v518_v58 = vmul.f32 0.01, %v499_v54  ;;  %v476_v59 = vmul.f32 %v1528_v33, %v446_v55  ;;  %1275 = vmatmul.mubr.bf16.gmra.mrb[8].mxu0 %v547_v50  ;;  %v475_v60 = vmul.f32 %v1528_v33, %v441_v56 }
  0xb3   : > { %v548_v61 = vpack.c.bf16 %v536_v51, %v535_v52 }
  0xb4   : > { %v538_v62 = vmax.f32 %v500_v53, %v519_v57  ;;  %v537_v63 = vmax.f32 %v499_v54, %v518_v58  ;;  %v502_v0 = vadd.f32 %v1533_v36, %v476_v59  ;;  %v501_v1 = vadd.f32 %v1533_v36, %v475_v60 }
  0xb5   : > { %1278 = vmatprep.mubr.bf16.mxu0 %v548_v61  ;;  %v451_v2 = vpop.permute.xlu0 %450 }
  0xb6   : > { %v521_v3 = vmul.f32 0.01, %v502_v0  ;;  %v520_v4 = vmul.f32 0.01, %v501_v1  ;;  %v477_v5 = vmul.f32 %v1528_v33, %v451_v2  ;;  %v549_v6 = vpack.c.bf16 %v538_v62, %v537_v63  ;;  %v1347_v33 = vld [vmem:[%s1729_s6 + $0x30] sm:$0xff]  }
  0xb7   : > { %1298 = vmatprep.subr.bf16.mxu1 %v1347_v33 }
  0xb8   : > { %v540_v7 = vmax.f32 %v502_v0, %v521_v3  ;;  %v539_v8 = vmax.f32 %v501_v1, %v520_v4  ;;  %v503_v9 = vadd.f32 %v1533_v36, %v477_v5  ;;  %1299 = vmatpush3.bf16.msra.mxu1 %v1347_v33  ;;  %v1348_v36 = vld [vmem:[%s1729_s6 + $0x38] sm:$0xff]  }
  0xb9   : > { %1300 = vmatprep.subr.bf16.mxu1 %v1348_v36 }
  0xba   : > { %v522_v10 = vmul.f32 0.01, %v503_v9  ;;  %1279 = vmatmul.mubr.bf16.gmra.mrb[12].mxu0 %v549_v6  ;;  %v550_v11 = vpack.c.bf16 %v540_v7, %v539_v8 }
  0xbc   : > { %1282 = vmatprep.mubr.bf16.mxu0 %v550_v11  ;;  %v541_v12 = vmax.f32 %v503_v9, %v522_v10  ;;  %1301 = vmatpush3.bf16.msra.mxu1 %v1348_v36 }
  0xbe   : > { %v551_v13 = vpack.c.bf16 %v541_v12, %v541_v12 }
  0xc2   : > { %1283 = vmatmul.mubr.bf16.gmra.mrb[16].mxu0 %v551_v13 }
 0x175   : > { %v1268_v16 = vpop.f32.mrb[0].mxu0 }
 0x176   : > { %v666_v17 = vadd.f32 %v1268_v16, %v1585_v15  ;;  %v657_v18 = vpop.f32.mrb[1].mxu0 }
 0x177   : > { %v658_v19 = vadd.f32 %v1585_v15, %v657_v18  ;;  %v1269_v20 = vpop.f32.mrb[2].mxu0 }
 0x178   : > { %v737_v21 = vmul.f32 0.01, %v666_v17  ;;  %v669_v22 = vadd.f32 %v1269_v20, %v1585_v15  ;;  %v660_v23 = vpop.f32.mrb[3].mxu0 }
 0x179   : > { %v735_v24 = vmul.f32 0.01, %v658_v19  ;;  %v661_v25 = vadd.f32 %v1585_v15, %v660_v23 }
 0x17a   : > { %v738_v26 = vmul.f32 0.01, %v669_v22  ;;  %v756_v28 = vmax.f32 %v666_v17, %v737_v21 }
 0x17b   : > { %v736_v27 = vmul.f32 0.01, %v661_v25  ;;  %v754_v31 = vmax.f32 %v658_v19, %v735_v24 }
 0x17c   : > { %v757_v29 = vmax.f32 %v669_v22, %v738_v26 }
 0x17d   : > { %v1272_v30 = vpop.f32.mrb[4].mxu0  ;;  %v755_v32 = vmax.f32 %v661_v25, %v736_v27 }
 0x17e   : > { %v682_v34 = vadd.f32 %v1272_v30, %v1585_v15  ;;  %v673_v35 = vpop.f32.mrb[5].mxu0  ;;  %v774_v37 = vpack.c.bf16 %v757_v29, %v756_v28 }
 0x17f   : > { %v674_v38 = vadd.f32 %v1585_v15, %v673_v35  ;;  %v1273_v39 = vpop.f32.mrb[6].mxu0  ;;  %v773_v40 = vpack.c.bf16 %v755_v32, %v754_v31 }
 0x180   : > { %v741_v41 = vmul.f32 0.01, %v682_v34  ;;  %v685_v42 = vadd.f32 %v1273_v39, %v1585_v15  ;;  %v676_v43 = vpop.f32.mrb[7].mxu0 }
 0x181   : > { %v739_v44 = vmul.f32 0.01, %v674_v38  ;;  %v677_v45 = vadd.f32 %v1585_v15, %v676_v43  ;;  %1302 = vmatprep.mubr.bf16.mxu1 %v773_v40 }
 0x182   : > { %v742_v46 = vmul.f32 0.01, %v685_v42  ;;  %1303 = vmatmul.mubr.bf16.vlgmr.msra.gmra.mrb[0].mxu1 %v774_v37  ;;  %v760_v48 = vmax.f32 %v682_v34, %v741_v41 }
 0x183   : > { %v740_v47 = vmul.f32 0.01, %v677_v45  ;;  %v758_v50 = vmax.f32 %v674_v38, %v739_v44 }
 0x184   : > { %v761_v49 = vmax.f32 %v685_v42, %v742_v46  ;;  %v1609_v42 = vld [vmem:[%s1730_s7] ss:$0 sm:$0xff] }
 0x185   : > { %v759_v51 = vmax.f32 %v677_v45, %v740_v47  ;;  %v1276_v52 = vpop.f32.mrb[8].mxu0 }
 0x186   : > { %v698_v53 = vadd.f32 %v1276_v52, %v1585_v15  ;;  %v689_v54 = vpop.f32.mrb[9].mxu0  ;;  %v776_v55 = vpack.c.bf16 %v761_v49, %v760_v48  ;;  %v1618_v52 = vld [vmem:[%s1731_s8] ss:$0 sm:$0xff] }
 0x187   : > { %v690_v56 = vadd.f32 %v1585_v15, %v689_v54  ;;  %v1277_v57 = vpop.f32.mrb[10].mxu0  ;;  %v775_v58 = vpack.c.bf16 %v759_v51, %v758_v50 }
 0x188   : > { %v745_v59 = vmul.f32 0.01, %v698_v53  ;;  %v701_v60 = vadd.f32 %v1277_v57, %v1585_v15  ;;  %v692_v61 = vpop.f32.mrb[11].mxu0 }
 0x189   : > { %v743_v62 = vmul.f32 0.01, %v690_v56  ;;  %v693_v63 = vadd.f32 %v1585_v15, %v692_v61  ;;  %1306 = vmatprep.mubr.bf16.mxu1 %v775_v58 }
 0x18a   : > { %v746_v0 = vmul.f32 0.01, %v701_v60  ;;  %1307 = vmatmul.mubr.bf16.gmra.mrb[4].mxu1 %v776_v55  ;;  %v764_v2 = vmax.f32 %v698_v53, %v745_v59 }
 0x18b   : > { %v744_v1 = vmul.f32 0.01, %v693_v63  ;;  %v762_v4 = vmax.f32 %v690_v56, %v743_v62 }
 0x18c   : > { %v765_v3 = vmax.f32 %v701_v60, %v746_v0 }
 0x18d   : > { %v763_v5 = vmax.f32 %v693_v63, %v744_v1  ;;  %v1280_v6 = vpop.f32.mrb[12].mxu0 }
 0x18e   : > { %v714_v7 = vadd.f32 %v1280_v6, %v1585_v15  ;;  %v705_v8 = vpop.f32.mrb[13].mxu0  ;;  %v778_v9 = vpack.c.bf16 %v765_v3, %v764_v2 }
 0x18f   : > { %v706_v10 = vadd.f32 %v1585_v15, %v705_v8  ;;  %v1281_v11 = vpop.f32.mrb[14].mxu0  ;;  %v777_v12 = vpack.c.bf16 %v763_v5, %v762_v4 }
 0x190   : > { %v749_v13 = vmul.f32 0.01, %v714_v7  ;;  %v717_v14 = vadd.f32 %v1281_v11, %v1585_v15  ;;  %v708_v33 = vpop.f32.mrb[15].mxu0 }
 0x191   : > { %v747_v36 = vmul.f32 0.01, %v706_v10  ;;  %v709_v16 = vadd.f32 %v1585_v15, %v708_v33  ;;  %1310 = vmatprep.mubr.bf16.mxu1 %v777_v12 }
 0x192   : > { %v750_v17 = vmul.f32 0.01, %v717_v14  ;;  %1311 = vmatmul.mubr.bf16.gmra.mrb[8].mxu1 %v778_v9  ;;  %v768_v19 = vmax.f32 %v714_v7, %v749_v13 }
 0x193   : > { %v748_v18 = vmul.f32 0.01, %v709_v16  ;;  %v766_v21 = vmax.f32 %v706_v10, %v747_v36 }
 0x194   : > { %v769_v20 = vmax.f32 %v717_v14, %v750_v17 }
 0x195   : > { %v767_v22 = vmax.f32 %v709_v16, %v748_v18  ;;  %v1284_v23 = vpop.f32.mrb[16].mxu0 }
 0x196   : > { %v730_v24 = vadd.f32 %v1284_v23, %v1585_v15  ;;  %v721_v25 = vpop.f32.mrb[17].mxu0  ;;  %v780_v26 = vpack.c.bf16 %v769_v20, %v768_v19 }
 0x197   : > { %v722_v27 = vadd.f32 %v1585_v15, %v721_v25  ;;  %v1285_v28 = vpop.f32.mrb[18].mxu0  ;;  %v779_v29 = vpack.c.bf16 %v767_v22, %v766_v21 }
 0x198   : > { %v753_v30 = vmul.f32 0.01, %v730_v24  ;;  %v724_v31 = vpop.f32.mrb[19].mxu0 }
 0x199   : > { %v751_v32 = vmul.f32 0.01, %v722_v27  ;;  %v725_v34 = vadd.f32 %v1585_v15, %v724_v31  ;;  %1314 = vmatprep.mubr.bf16.mxu1 %v779_v29 }
 0x19a   : > { %1315 = vmatmul.mubr.bf16.gmra.mrb[12].mxu1 %v780_v26  ;;  %v772_v37 = vmax.f32 %v730_v24, %v753_v30 }
 0x19b   : > { %v752_v35 = vmul.f32 0.01, %v725_v34  ;;  %v770_v38 = vmax.f32 %v722_v27, %v751_v32 }
 0x19c   : > { %v782_v41 = vpack.c.bf16 %v772_v37, %v772_v37 }
 0x19d   : > { %v771_v39 = vmax.f32 %v725_v34, %v752_v35 }
 0x19f   : > { %v781_v40 = vpack.c.bf16 %v771_v39, %v770_v38 }
 0x1a1   : > { %1318 = vmatprep.mubr.bf16.mxu1 %v781_v40 }
 0x1a2   : > { %1319 = vmatmul.mubr.bf16.gmra.mrb[16].mxu1 %v782_v41 }
 0x255   : > { %v1304_v43 = vpop.f32.mrb[0].mxu1 }
 0x256   : > { %v897_v44 = vadd.f32 %v1304_v43, %v1609_v42  ;;  %v888_v45 = vpop.f32.mrb[1].mxu1 }
 0x257   : > { %v889_v15 = vadd.f32 %v1609_v42, %v888_v45  ;;  %v1305_v46 = vpop.f32.mrb[2].mxu1 }
 0x258   : > { %v968_v47 = vmul.f32 0.01, %v897_v44  ;;  %v900_v48 = vadd.f32 %v1305_v46, %v1609_v42  ;;  %v891_v49 = vpop.f32.mrb[3].mxu1 }
 0x259   : > { %v966_v50 = vmul.f32 0.01, %v889_v15  ;;  %v892_v51 = vadd.f32 %v1609_v42, %v891_v49 }
 0x25a   : > { %v987_v53 = vmax.f32 %v897_v44, %v968_v47  ;;  %v969_v54 = vmul.f32 0.01, %v900_v48 }
 0x25b   : > { %v985_v55 = vmax.f32 %v889_v15, %v966_v50  ;;  %v967_v56 = vmul.f32 0.01, %v892_v51 }
 0x25c   : > { %v1013_v57 = vmul.f32 %v1618_v52, %v987_v53  ;;  %v988_v58 = vmax.f32 %v900_v48, %v969_v54 }
 0x25d   : > { %v986_v59 = vmax.f32 %v892_v51, %v967_v56  ;;  %v1308_v60 = vpop.f32.mrb[4].mxu1  ;;  %v1011_v61 = vmul.f32 %v1618_v52, %v985_v55 }
 0x25e   : > { %v913_v62 = vadd.f32 %v1308_v60, %v1609_v42  ;;  %1034 = vadd.xlane.f32.xlu0 %v1013_v57  ;;  %v904_v63 = vpop.f32.mrb[5].mxu1  ;;  %v1014_v8 = vmul.f32 %v1618_v52, %v988_v58 }
 0x25f   : > { %v905_v0 = vadd.f32 %v1609_v42, %v904_v63  ;;  %1030 = vadd.xlane.f32.xlu1 %v1011_v61  ;;  %v1309_v1 = vpop.f32.mrb[6].mxu1  ;;  %v1012_v2 = vmul.f32 %v1618_v52, %v986_v59 }
 0x260   : > { %v972_v3 = vmul.f32 0.01, %v913_v62  ;;  %v916_v4 = vadd.f32 %v1309_v1, %v1609_v42  ;;  %v907_v5 = vpop.f32.mrb[7].mxu1 }
 0x261   : > { %v970_v6 = vmul.f32 0.01, %v905_v0  ;;  %v908_v7 = vadd.f32 %v1609_v42, %v907_v5 }
 0x262   : > { %v991_v9 = vmax.f32 %v913_v62, %v972_v3  ;;  %v973_v10 = vmul.f32 0.01, %v916_v4  ;;  %1032 = vadd.xlane.f32.xlu0 %v1012_v2 }
 0x263   : > { %v971_v11 = vmul.f32 0.01, %v908_v7  ;;  %1036 = vadd.xlane.f32.xlu1 %v1014_v8  ;;  %v989_v12 = vmax.f32 %v905_v0, %v970_v6 }
 0x264   : > { %v992_v13 = vmax.f32 %v916_v4, %v973_v10  ;;  %v1017_v14 = vmul.f32 %v1618_v52, %v991_v9 }
 0x265   : > { %v1312_v33 = vpop.f32.mrb[8].mxu1  ;;  %v990_v36 = vmax.f32 %v908_v7, %v971_v11  ;;  %v1015_v24 = vmul.f32 %v1618_v52, %v989_v12 }
 0x266   : > { %v929_v16 = vadd.f32 %v1312_v33, %v1609_v42  ;;  %1042 = vadd.xlane.f32.xlu0 %v1017_v14  ;;  %v920_v17 = vpop.f32.mrb[9].mxu1  ;;  %v1018_v18 = vmul.f32 %v1618_v52, %v992_v13  ;;  %v1654_v13 = vstv %s1068_s21 }
 0x267   : > { %v921_v19 = vadd.f32 %v1609_v42, %v920_v17  ;;  %v1313_v20 = vpop.f32.mrb[10].mxu1  ;;  %v1016_v29 = vmul.f32 %v1618_v52, %v990_v36 }
 0x268   : > { %v976_v21 = vmul.f32 0.01, %v929_v16  ;;  %v932_v22 = vadd.f32 %v1313_v20, %v1609_v42  ;;  %1044 = vadd.xlane.f32.xlu1 %v1018_v18  ;;  %v923_v23 = vpop.f32.mrb[11].mxu1 }
 0x269   : > { %v974_v25 = vmul.f32 0.01, %v921_v19  ;;  %v924_v26 = vadd.f32 %v1609_v42, %v923_v23 }
 0x26a   : > { %v995_v27 = vmax.f32 %v929_v16, %v976_v21  ;;  %v977_v28 = vmul.f32 0.01, %v932_v22  ;;  %1038 = vadd.xlane.f32.xlu0 %v1015_v24 }
 0x26b   : > { %v975_v30 = vmul.f32 0.01, %v924_v26  ;;  %v993_v31 = vmax.f32 %v921_v19, %v974_v25 }
 0x26c   : > { %v996_v32 = vmax.f32 %v932_v22, %v977_v28  ;;  %1040 = vadd.xlane.f32.xlu1 %v1016_v29  ;;  %v1021_v34 = vmul.f32 %v1618_v52, %v995_v27 }
 0x26d   : > { %v1316_v35 = vpop.f32.mrb[12].mxu1  ;;  %v994_v37 = vmax.f32 %v924_v26, %v975_v30  ;;  %v1019_v46 = vmul.f32 %v1618_v52, %v993_v31 }
 0x26e   : > { %v945_v38 = vadd.f32 %v1316_v35, %v1609_v42  ;;  %1050 = vadd.xlane.f32.xlu0 %v1021_v34  ;;  %v936_v39 = vpop.f32.mrb[13].mxu1  ;;  %v1022_v40 = vmul.f32 %v1618_v52, %v996_v32 }
 0x26f   : > { %v937_v41 = vadd.f32 %v1609_v42, %v936_v39  ;;  %v1317_v43 = vpop.f32.mrb[14].mxu1  ;;  %v1020_v51 = vmul.f32 %v1618_v52, %v994_v37 }
 0x270   : > { %v980_v44 = vmul.f32 0.01, %v945_v38  ;;  %v948_v45 = vadd.f32 %v1317_v43, %v1609_v42  ;;  %1052 = vadd.xlane.f32.xlu1 %v1022_v40  ;;  %v939_v15 = vpop.f32.mrb[15].mxu1 }
 0x271   : > { %v978_v47 = vmul.f32 0.01, %v937_v41  ;;  %v940_v48 = vadd.f32 %v1609_v42, %v939_v15 }
 0x272   : > { %v999_v49 = vmax.f32 %v945_v38, %v980_v44  ;;  %v981_v50 = vmul.f32 0.01, %v948_v45  ;;  %1046 = vadd.xlane.f32.xlu0 %v1019_v46 }
 0x273   : > { %v979_v53 = vmul.f32 0.01, %v940_v48  ;;  %v997_v54 = vmax.f32 %v937_v41, %v978_v47 }
 0x274   : > { %v1000_v55 = vmax.f32 %v948_v45, %v981_v50  ;;  %1048 = vadd.xlane.f32.xlu1 %v1020_v51  ;;  %v1025_v56 = vmul.f32 %v1618_v52, %v999_v49 }
 0x275   : > { %v1320_v57 = vpop.f32.mrb[16].mxu1  ;;  %v998_v58 = vmax.f32 %v940_v48, %v979_v53  ;;  %v1023_v1 = vmul.f32 %v1618_v52, %v997_v54 }
 0x276   : > { %v961_v59 = vadd.f32 %v1320_v57, %v1609_v42  ;;  %1058 = vadd.xlane.f32.xlu0 %v1025_v56  ;;  %v952_v60 = vpop.f32.mrb[17].mxu1  ;;  %v1026_v61 = vmul.f32 %v1618_v52, %v1000_v55 }
 0x277   : > { %v953_v62 = vadd.f32 %v1609_v42, %v952_v60  ;;  %v1321_v63 = vpop.f32.mrb[18].mxu1  ;;  %v1024_v5 = vmul.f32 %v1618_v52, %v998_v58 }
 0x278   : > { %1060 = vadd.xlane.f32.xlu1 %v1026_v61  ;;  %v955_v0 = vpop.f32.mrb[19].mxu1  ;;  %v984_v2 = vmul.f32 0.01, %v961_v59 }
 0x279   : > { %v982_v3 = vmul.f32 0.01, %v953_v62  ;;  %v956_v4 = vadd.f32 %v1609_v42, %v955_v0 }
 0x27a   : > { %1054 = vadd.xlane.f32.xlu0 %v1023_v1  ;;  %v1003_v8 = vmax.f32 %v961_v59, %v984_v2 }
 0x27b   : > { %v1001_v6 = vmax.f32 %v953_v62, %v982_v3  ;;  %v983_v7 = vmul.f32 0.01, %v956_v4 }
 0x27c   : > { %1056 = vadd.xlane.f32.xlu1 %v1024_v5  ;;  %v1029_v12 = vmul.f32 %v1618_v52, %v1003_v8 }
 0x27d   : > { %v1002_v9 = vmax.f32 %v956_v4, %v983_v7  ;;  %v1027_v10 = vmul.f32 %v1618_v52, %v1001_v6 }
 0x27f   : > { %1062 = vadd.xlane.f32.xlu0 %v1027_v10  ;;  %v1028_v11 = vmul.f32 %v1618_v52, %v1002_v9 }
 0x281   : > { %1064 = vadd.xlane.f32.xlu1 %v1028_v11 }
 0x283   : > { %1066 = vadd.xlane.f32.xlu0 %v1029_v12 }
 0x2eb   : > { %v1035_v42 = vpop.xlane.xlu0 %1034 }
 0x2ec   : > { %v1072_v14 = vadd.f32 %v1654_v13, %v1035_v42  ;;  %v1031_v33 = vpop.xlane.xlu1 %1030 }
 0x2ed   : > { %v1070_v36 = vadd.f32 %v1654_v13, %v1031_v33 }
 0x2ee   : > { %1349 = vtanh.f32 %v1072_v14 }
 0x2ef   : > { %1351 = vtanh.f32 %v1070_v36  ;;  %v1033_v16 = vpop.xlane.xlu0 %1032 }
 0x2f0   : > { %v1071_v17 = vadd.f32 %v1654_v13, %v1033_v16  ;;  %v1037_v18 = vpop.xlane.xlu1 %1036 }
 0x2f1   : > { %v1073_v19 = vadd.f32 %v1654_v13, %v1037_v18 }
 0x2f2   : > { %1353 = vtanh.f32 %v1071_v17 }
 0x2f3   : > { %1355 = vtanh.f32 %v1073_v19  ;;  %v1043_v52 = vpop.xlane.xlu0 %1042 }
 0x2f4   : > { %v1076_v20 = vadd.f32 %v1654_v13, %v1043_v52 }
 0x2f5   : > { %v1045_v21 = vpop.xlane.xlu1 %1044 }
 0x2f6   : > { %1357 = vtanh.f32 %v1076_v20  ;;  %v1077_v22 = vadd.f32 %v1654_v13, %v1045_v21 }
 0x2f7   : > { %v1039_v23 = vpop.xlane.xlu0 %1038 }
 0x2f8   : > { %v1350_v24 = vpop.eup %1349  ;;  %1359 = vtanh.f32 %v1077_v22  ;;  %v1074_v25 = vadd.f32 %v1654_v13, %v1039_v23 }
 0x2f9   : > { %v1352_v26 = vpop.eup %1351  ;;  %1111 = vst.msk [vmem:[%s1666_s24 + $0x10] sm:$0xff] %vm1108_vm0, %v1350_v24  ;;  %v1041_v27 = vpop.xlane.xlu1 %1040 }
 0x2fa   : > { %1109 = vst.msk [vmem:[%s1666_s24] sm:$0xff] %vm1108_vm0, %v1352_v26  ;;  %1361 = vtanh.f32 %v1074_v25  ;;  %v1075_v28 = vadd.f32 %v1654_v13, %v1041_v27 }
 0x2fb   : > { %v1051_v29 = vpop.xlane.xlu0 %1050 }
 0x2fc   : > { %v1354_v30 = vpop.eup %1353  ;;  %1363 = vtanh.f32 %v1075_v28  ;;  %v1080_v31 = vadd.f32 %v1654_v13, %v1051_v29 }
 0x2fd   : > { %v1356_v32 = vpop.eup %1355  ;;  %1110 = vst.msk [vmem:[%s1666_s24 + $0x8] sm:$0xff] %vm1108_vm0, %v1354_v30  ;;  %v1053_v34 = vpop.xlane.xlu1 %1052 }
 0x2fe   : > { %1112 = vst.msk [vmem:[%s1666_s24 + $0x18] sm:$0xff] %vm1108_vm0, %v1356_v32  ;;  %1365 = vtanh.f32 %v1080_v31  ;;  %v1081_v35 = vadd.f32 %v1654_v13, %v1053_v34 }
 0x2ff   : > { %v1047_v37 = vpop.xlane.xlu0 %1046 }
 0x300   : > { %v1358_v38 = vpop.eup %1357  ;;  %1367 = vtanh.f32 %v1081_v35  ;;  %v1078_v39 = vadd.f32 %v1654_v13, %v1047_v37 }
 0x301   : > { %1115 = vst.msk [vmem:[%s1666_s24 + $0x30] sm:$0xff] %vm1108_vm0, %v1358_v38  ;;  %v1049_v40 = vpop.xlane.xlu1 %1048 }
 0x302   : > { %v1360_v41 = vpop.eup %1359  ;;  %1369 = vtanh.f32 %v1078_v39  ;;  %v1079_v43 = vadd.f32 %v1654_v13, %v1049_v40 }
 0x303   : > { %1116 = vst.msk [vmem:[%s1666_s24 + $0x38] sm:$0xff] %vm1108_vm0, %v1360_v41  ;;  %v1059_v44 = vpop.xlane.xlu0 %1058 }
 0x304   : > { %v1362_v45 = vpop.eup %1361  ;;  %1371 = vtanh.f32 %v1079_v43  ;;  %v1084_v15 = vadd.f32 %v1654_v13, %v1059_v44 }
 0x305   : > { %1113 = vst.msk [vmem:[%s1666_s24 + $0x20] sm:$0xff] %vm1108_vm0, %v1362_v45  ;;  %v1061_v46 = vpop.xlane.xlu1 %1060 }
 0x306   : > { %v1364_v47 = vpop.eup %1363  ;;  %1373 = vtanh.f32 %v1084_v15  ;;  %v1085_v48 = vadd.f32 %v1654_v13, %v1061_v46 }
 0x307   : > { %1114 = vst.msk [vmem:[%s1666_s24 + $0x28] sm:$0xff] %vm1108_vm0, %v1364_v47  ;;  %v1055_v49 = vpop.xlane.xlu0 %1054 }
 0x308   : > { %v1366_v50 = vpop.eup %1365  ;;  %1375 = vtanh.f32 %v1085_v48  ;;  %v1082_v51 = vadd.f32 %v1654_v13, %v1055_v49 }
 0x309   : > { %1119 = vst.msk [vmem:[%s1666_s24 + $0x50] sm:$0xff] %vm1108_vm0, %v1366_v50  ;;  %v1057_v53 = vpop.xlane.xlu1 %1056 }
 0x30a   : > { %v1368_v54 = vpop.eup %1367  ;;  %1377 = vtanh.f32 %v1082_v51  ;;  %v1083_v55 = vadd.f32 %v1654_v13, %v1057_v53 }
 0x30b   : > { %1120 = vst.msk [vmem:[%s1666_s24 + $0x58] sm:$0xff] %vm1108_vm0, %v1368_v54 }
 0x30c   : > { %v1370_v56 = vpop.eup %1369  ;;  %1379 = vtanh.f32 %v1083_v55  ;;  %v1063_v57 = vpop.xlane.xlu0 %1062 }
 0x30d   : > { %1117 = vst.msk [vmem:[%s1666_s24 + $0x40] sm:$0xff] %vm1108_vm0, %v1370_v56  ;;  %v1086_v58 = vadd.f32 %v1654_v13, %v1063_v57 }
 0x30e   : > { %v1372_v59 = vpop.eup %1371  ;;  %v1065_v60 = vpop.xlane.xlu1 %1064 }
 0x30f   : > { %1118 = vst.msk [vmem:[%s1666_s24 + $0x48] sm:$0xff] %vm1108_vm0, %v1372_v59  ;;  %1381 = vtanh.f32 %v1086_v58  ;;  %v1087_v61 = vadd.f32 %v1654_v13, %v1065_v60 }
 0x310   : > { %v1374_v62 = vpop.eup %1373  ;;  %v1067_v63 = vpop.xlane.xlu0 %1066 }
 0x311   : > { %1123 = vst.msk [vmem:[%s1666_s24 + $0x70] sm:$0xff] %vm1108_vm0, %v1374_v62  ;;  %1383 = vtanh.f32 %v1087_v61  ;;  %v1088_v0 = vadd.f32 %v1654_v13, %v1067_v63 }
 0x312   : > { %v1376_v1 = vpop.eup %1375 }
 0x313   : > { %1124 = vst.msk [vmem:[%s1666_s24 + $0x78] sm:$0xff] %vm1108_vm0, %v1376_v1  ;;  %1385 = vtanh.f32 %v1088_v0 }
 0x314   : > { %v1378_v2 = vpop.eup %1377 }
 0x315   : > { %1121 = vst.msk [vmem:[%s1666_s24 + $0x60] sm:$0xff] %vm1108_vm0, %v1378_v2 }
 0x316   : > { %v1380_v3 = vpop.eup %1379 }
 0x317   : > { %1122 = vst.msk [vmem:[%s1666_s24 + $0x68] sm:$0xff] %vm1108_vm0, %v1380_v3 }
 0x319   : > { %v1382_v4 = vpop.eup %1381 }
 0x31a   : > { %1125 = vst.msk [vmem:[%s1666_s24 + $0x80] sm:$0xff] %vm1108_vm0, %v1382_v4 }
 0x31b   : > { %v1384_v5 = vpop.eup %1383 }
 0x31c   : > { %1126 = vst.msk [vmem:[%s1666_s24 + $0x88] sm:$0xff] %vm1108_vm0, %v1384_v5 }
 0x31d   : > { %v1386_v6 = vpop.eup %1385 }
 0x31e   : > { %1127 = vst.msk [vmem:[%s1666_s24 + $0x90] sm:$0xff] %vm1108_vm0, %v1386_v6 }
 0x31f PF: > { %s20_s11 = sadd.s32 1, %s1393_s11  }
 0x320   : > { %p17_p4 = scmp.ge.s32.totalorder %s20_s11, 4  }
 0x322   :  { %19 = sbr.rel (!%p17_p4) target bundleno = 2 (0x2), region = 86 }

</bundles_post_ra>
